<compile_context>
chip_gen: v6e
topology: v6e:2x2x1
jax: 0.10.0
libtpu: 0.0.40
codegen_flags: <defaults>
</compile_context>

<pallas_src>
import jax
import jax.numpy as jnp
from jax.experimental import pallas as pl
from jax.experimental.pallas import tpu as pltpu


def _make_mse_kernel(tm, lanes, rows, steps_per_core, needs_mask):
    acc_is_8 = (tm % 8 == 0)

    def kernel(p_ref, t_ref, acc_ref):
        s = pl.program_id(1)

        @pl.when(s == 0)
        def _init():
            acc_ref[...] = jnp.zeros_like(acc_ref)

        d = p_ref[...].astype(jnp.float32) - t_ref[...].astype(jnp.float32)
        sq = d * d

        if needs_mask:
            # Zero contributions from rows past the true row count (partial
            # last block and/or duplicated clamped steps).
            step = pl.program_id(0) * steps_per_core + s
            row_id = step * tm + jax.lax.broadcasted_iota(
                jnp.int32, (tm, lanes), 0)
            sq = jnp.where(row_id < rows, sq, 0.0)

        if acc_is_8:
            # Fold rows into the (8, lanes) accumulator with plain vadds
            # (sublane-tile aligned reshape; no cross-lane work per step).
            acc_ref[...] += sq.reshape(tm // 8, 8, lanes).sum(axis=0)
        else:
            # Tiny input (< 8 rows): single (1, lanes) accumulator row.
            acc_ref[...] += jnp.sum(sq, axis=0, keepdims=True)

    return kernel


def mse_loss(preds, targets, weight=None, *,
             target_block_elems=512 * 1024, n_split=2):
    """MSE loss over arbitrary-shape inputs, matching the PyTorch module."""
    assert preds.shape == targets.shape, (preds.shape, targets.shape)
    T = int(preds.size)
    f32 = jnp.float32

    if weight is None:
        w = f32(1.0)
    else:
        # TODO(synk): non-scalar (broadcasting) `weight` is not supported;
        # the module's default path is a scalar buffer.
        w = jnp.asarray(weight, dtype=jnp.float32).reshape(())

    flat_p = preds.reshape(-1)
    flat_t = targets.reshape(-1)

    if T < 128:
        # Too small for a lane-dense kernel block; plain JAX.
        d = flat_p.astype(f32) - flat_t.astype(f32)
        return jnp.sum(d * d) * w * f32(1.0 / T)

    # ---- lane-dense layout: last dim = multiple of 128 that divides T ----
    lanes = None
    for cand in (1024, 512, 256, 128):
        if T % cand == 0:
            lanes = cand
            break

    tail_sum = f32(0.0)
    if lanes is None:
        # Element count not a multiple of 128: run the kernel on the bulk and
        # add the <128-element tail in plain JAX.
        # TODO(synk): the prefix slice may cost one extra HBM pass over the
        # bulk when T % 128 != 0 (XLA cannot alias it into the custom call).
        lanes = 128
        bulk = (T // lanes) * lanes
        dt = flat_p[bulk:].astype(f32) - flat_t[bulk:].astype(f32)
        tail_sum = jnp.sum(dt * dt)
        flat_p = flat_p[:bulk]
        flat_t = flat_t[:bulk]

    rows = flat_p.size // lanes
    p2 = flat_p.reshape(rows, lanes)   # contiguous reshape -> free
    t2 = flat_t.reshape(rows, lanes)

    # ---- row tiling: ~target_block_elems per block (2 MiB f32 default) ----
    if rows >= 8:
        tm = max(8, (target_block_elems // lanes) // 8 * 8)
        tm = min(tm, (rows // 8) * 8)
    else:
        tm = rows                       # full-extent (tiny) block

    n_blocks = pl.cdiv(rows, tm)
    nsp = max(1, min(n_split, n_blocks))    # outer "parallel" split (v7x 2 TCs)
    spc = pl.cdiv(n_blocks, nsp)            # reduction steps per split
    needs_mask = (nsp * spc * tm != rows)
    acc_rows = 8 if tm % 8 == 0 else 1

    def in_map(c, s):
        # Clamp so any duplicate trailing steps (when nsp*spc > n_blocks)
        # re-read a valid block; their contribution is zeroed by the mask.
        return (jnp.minimum(c * spc + s, n_blocks - 1), 0)

    kernel = _make_mse_kernel(tm, lanes, rows, spc, needs_mask)

    bytes_in = 2 * rows * lanes * p2.dtype.itemsize
    partials = pl.pallas_call(
        kernel,
        out_shape=jax.ShapeDtypeStruct((nsp * acc_rows, lanes), jnp.float32),
        grid_spec=pltpu.PrefetchScalarGridSpec(
            num_scalar_prefetch=0,
            grid=(nsp, spc),
            in_specs=[
                pl.BlockSpec((tm, lanes), in_map),
                pl.BlockSpec((tm, lanes), in_map),
            ],
            out_specs=pl.BlockSpec((acc_rows, lanes), lambda c, s: (c, 0)),
        ),
        compiler_params=pltpu.CompilerParams(
            dimension_semantics=("parallel", "arbitrary"),
            vmem_limit_bytes=32 * 1024 * 1024,
        ),
        cost_estimate=pl.CostEstimate(
            flops=3 * rows * lanes,
            transcendentals=0,
            bytes_accessed=bytes_in + nsp * acc_rows * lanes * 4),
    )(p2, t2)

    total = jnp.sum(partials) + tail_sum
    # mean over the *original* element count; scalar weight applied once.
    return total * w * f32(1.0 / T)


if __name__ == "__main__":
    key = jax.random.PRNGKey(0)
    kp, kt, kp2, kt2 = jax.random.split(key, 4)

    # Primary check: the module's documented (N, C, L) input, small shape.
    N, C, L = 2, 4, 16
    preds = jax.random.normal(kp, (N, C, L), dtype=jnp.float32)
    targets = jax.random.normal(kt, (N, C, L), dtype=jnp.float32)

    loss = jax.jit(mse_loss)(preds, targets)       # weight=None -> 1.0
    loss = jax.block_until_ready(loss)
    ref = jnp.mean((preds - targets) ** 2)
    assert jnp.allclose(loss, ref, rtol=1e-5, atol=1e-6), (loss, ref)

    # Secondary check: exercises multi-block, masked tail and 2-way split.
    N2, C2, L2 = 2, 9, 128
    p_big = jax.random.normal(kp2, (N2, C2, L2), dtype=jnp.float32)
    t_big = jax.random.normal(kt2, (N2, C2, L2), dtype=jnp.float32)
    loss2 = jax.block_until_ready(mse_loss(p_big, t_big, weight=0.5))
    ref2 = 0.5 * jnp.mean((p_big - t_big) ** 2)
    assert jnp.allclose(loss2, ref2, rtol=1e-5, atol=1e-6), (loss2, ref2)

    print("KERNEL_OK")
</pallas_src>

<mosaic_0001>
module attributes {stable_mosaic.version = 11 : i64} {
  func.func @kernel(%arg0: i32, %arg1: i32, %arg2: memref<1x128xf32, #tpu.memory_space<vmem>>, %arg3: memref<1x128xf32, #tpu.memory_space<vmem>>, %arg4: memref<1x128xf32, #tpu.memory_space<vmem>>) attributes {dimension_semantics = [#tpu.dimension_semantics<parallel>, #tpu.dimension_semantics<arbitrary>], iteration_bounds = array<i64: 1, 1>, scalar_prefetch = 0 : i64, scratch_operands = 0 : i64, tpu.core_type = #tpu.core_type<tc>, window_params = [{transform_indices = @transform_0, window_bounds = array<i64: 1, 128>}, {transform_indices = @transform_1, window_bounds = array<i64: 1, 128>}, {transform_indices = @transform_2, window_bounds = array<i64: 1, 128>}]} {
    %c0_i32 = arith.constant 0 : i32
    %0 = arith.cmpi eq, %arg1, %c0_i32 : i32
    %1 = arith.extui %0 : i1 to i32
    %c0_i32_0 = arith.constant 0 : i32
    %2 = arith.cmpi ne, %1, %c0_i32_0 : i32
    scf.if %2 {
      %cst_8 = arith.constant 0.000000e+00 : f32
      %12 = vector.broadcast %cst_8 : f32 to vector<1x128xf32>
      %c0_9 = arith.constant 0 : index
      %c0_10 = arith.constant 0 : index
      %13 = vector.load %arg4[%c0_9, %c0_10] : memref<1x128xf32, #tpu.memory_space<vmem>>, vector<1x128xf32>
      tpu.vector_store %arg4[%c0_9, %c0_10], %12 {strides = array<i32>} : memref<1x128xf32, #tpu.memory_space<vmem>>, vector<1x128xf32>,
    } else {
    }
    %c0 = arith.constant 0 : index
    %c0_1 = arith.constant 0 : index
    %3 = vector.load %arg2[%c0, %c0_1] : memref<1x128xf32, #tpu.memory_space<vmem>>, vector<1x128xf32>
    %c0_2 = arith.constant 0 : index
    %c0_3 = arith.constant 0 : index
    %4 = vector.load %arg3[%c0_2, %c0_3] : memref<1x128xf32, #tpu.memory_space<vmem>>, vector<1x128xf32>
    %5 = arith.subf %3, %4 : vector<1x128xf32>
    %6 = arith.mulf %5, %5 : vector<1x128xf32>
    %c0_4 = arith.constant 0 : index
    %c0_5 = arith.constant 0 : index
    %7 = vector.load %arg4[%c0_4, %c0_5] : memref<1x128xf32, #tpu.memory_space<vmem>>, vector<1x128xf32>
    %cst = arith.constant dense<0.000000e+00> : vector<128xf32>
    %8 = vector.multi_reduction <add>, %6, %cst [0] : vector<1x128xf32> to vector<128xf32>
    %9 = vector.shape_cast %8 : vector<128xf32> to vector<1x128xf32>
    %10 = arith.addf %7, %9 : vector<1x128xf32>
    %c0_6 = arith.constant 0 : index
    %c0_7 = arith.constant 0 : index
    %11 = vector.load %arg4[%c0_6, %c0_7] : memref<1x128xf32, #tpu.memory_space<vmem>>, vector<1x128xf32>
    tpu.vector_store %arg4[%c0_6, %c0_7], %10 {strides = array<i32>} : memref<1x128xf32, #tpu.memory_space<vmem>>, vector<1x128xf32>,
    return
  }
  func.func @transform_0(%arg0: i32, %arg1: i32) -> (i32, i32) {
    %c1_i32 = arith.constant 1 : i32
    %0 = arith.muli %arg0, %c1_i32 : i32
    %1 = arith.addi %0, %arg1 : i32
    %c0_i32 = arith.constant 0 : i32
    %2 = arith.minsi %1, %c0_i32 : i32
    %c0_i32_0 = arith.constant 0 : i32
    %c0_i32_1 = arith.constant 0 : i32
    return %2, %c0_i32_0 : i32, i32
  }
  func.func @transform_1(%arg0: i32, %arg1: i32) -> (i32, i32) {
    %c1_i32 = arith.constant 1 : i32
    %0 = arith.muli %arg0, %c1_i32 : i32
    %1 = arith.addi %0, %arg1 : i32
    %c0_i32 = arith.constant 0 : i32
    %2 = arith.minsi %1, %c0_i32 : i32
    %c0_i32_0 = arith.constant 0 : i32
    %c0_i32_1 = arith.constant 0 : i32
    return %2, %c0_i32_0 : i32, i32
  }
  func.func @transform_2(%arg0: i32, %arg1: i32) -> (i32, i32) {
    %c0_i32 = arith.constant 0 : i32
    %c0_i32_0 = arith.constant 0 : i32
    return %arg0, %c0_i32 : i32, i32
  }
}

</mosaic_0001>

<bundles_post_ra>
// kernel: mse_loss.1
= control target key start
LH: loop header
LB: loop body
LE: loop exit
PB: predicated region body
PF: predicated region fallthrough
CT: control target
= control target key end

     0   :  { %v83_v0 = vmov 0.0   ;;  %s114_s2 = inlined_call_operand.vmem [shape: f32[1,128], index: 2, kind: output, shape index: {}]   ;;  %s115_s0 = inlined_call_operand.vmem [shape: f32[1,128], index: 0, kind: input, shape index: {}]   ;;  %s116_s1 = inlined_call_operand.vmem [shape: f32[1,128], index: 1, kind: input, shape index: {}]  }
   0x1   :  { %63 = vst [vmem:[%s114_s2] sm:$0x1] %v83_v0  ;;  %v64_v1 = vld [vmem:[%s115_s0] sm:$0x1] }
   0x2   :  { %v65_v2 = vld [vmem:[%s116_s1] sm:$0x1] }
   0x3   :  { %v66_v3 = vsub.f32 %v64_v1, %v65_v2 }
   0x5   :  { %v67_v4 = vmul.f32 %v66_v3, %v66_v3 }
   0x8   :  { %v68_v5 = vld [vmem:[%s114_s2] sm:$0x1] }
   0x9   :  { %v70_v6 = vadd.f32 %v68_v5, %v67_v4 }
   0xb   :  { %71 = vst [vmem:[%s114_s2] sm:$0x1] %v70_v6 }

</bundles_post_ra>
